<compile_context>
chip_gen: v6e
topology: v6e:2x2x1
jax: 0.10.0
libtpu: 0.0.40
codegen_flags: <defaults>
</compile_context>

<pallas_src>
import jax
import jax.numpy as jnp
import numpy as np
from jax.experimental import pallas as pl
from jax.experimental.pallas import tpu as pltpu


# ----------------------------------------------------------------------------- kernel
def encoder_kernel(
    xx_ref,       # (T*B, 2I)  row t*B+b = [x[t,b] | x[T-1-t,b]]  (fwd/bwd inputs paired)
    w_in_ref,     # (2I, 8H)   block-diag input weights, gate order [i,f,o,g], dir-interleaved
    b_in_ref,     # (1, 8H)    combined biases (b_ih + b_hh), same layout
    w_hh_ref,     # (2H, 8H)   block-diag hidden weights, same layout
    w_head_ref,   # (2H, 2Z)   [h2mu | h2sigma] weights (pre-transposed)
    b_head_ref,   # (1, 2Z)    [bmu | bsigma]
    eps_ref,      # (B, Z)     N(0,1) noise for the reparameterization trick
    out_ref,      # (3, B, Z)  out slab: [z, mu, sigma_hat]
):
    TB = xx_ref.shape[0]
    B, Z = eps_ref.shape
    T = TB // B
    H2 = w_hh_ref.shape[0]            # 2*H (forward | backward, interleaved per gate)

    # Hoisted input projection: one MXU op covers every timestep of BOTH
    # directions; nothing here sits on the serial h->h dependency chain.
    gx = (
        jnp.dot(xx_ref[...], w_in_ref[...], preferred_element_type=jnp.float32)
        + b_in_ref[...]
    )                                                           # (T*B, 8H)

    w_hh = w_hh_ref[...]                                        # hoisted load
    h = jnp.zeros((B, H2), jnp.float32)                         # [h_fwd | h_bwd]
    c = jnp.zeros((B, H2), jnp.float32)

    # Fused bidirectional recurrence, fully unrolled (T is small and static).
    # Gate-major layout: [ i(2H) | f(2H) | o(2H) | g(2H) ], each gate block is
    # [forward H | backward H], so elementwise math runs on both directions at
    # once and `h` ends up exactly equal to concat([h_fwd, h_bwd], axis=1).
    for s in range(T):
        gates = gx[s * B:(s + 1) * B, :] + jnp.dot(
            h, w_hh, preferred_element_type=jnp.float32
        )                                                       # (B, 8H)
        ifo = jax.nn.sigmoid(gates[:, 0:3 * H2])                # i, f, o in one EUP pass
        g = jnp.tanh(gates[:, 3 * H2:4 * H2])
        i = ifo[:, 0:H2]
        f = ifo[:, H2:2 * H2]
        o = ifo[:, 2 * H2:3 * H2]
        c = f * c + i * g
        h = o * jnp.tanh(c)

    # nn.Dropout is identity in eval/inference mode.
    # Single merged head matmul: [mu | sigma_hat] = h @ [Wmu | Wsig] + [bmu | bsig]
    heads = (
        jnp.dot(h, w_head_ref[...], preferred_element_type=jnp.float32)
        + b_head_ref[...]
    )                                                           # (B, 2Z)
    mu = heads[:, 0:Z]
    sigma_hat = heads[:, Z:2 * Z]
    sigma = jnp.exp(sigma_hat * 0.5)
    z = mu + sigma * eps_ref[...]                               # sample_normal(mu, sigma)

    out_ref[0] = z
    out_ref[1] = mu
    out_ref[2] = sigma_hat


# ----------------------------------------------------------------------------- params
def init_encoder_params(key, hidden_size, z_dims, input_size=5):
    """Deterministic synthetic parameters in PyTorch-like layout.

    Per-direction LSTM weights are stored pre-transposed for x @ W with the
    PyTorch gate column order [i, f, g, o]; biases are (b_ih + b_hh).
    """
    H, Z, I = hidden_size, z_dims, input_size
    ks = jax.random.split(key, 12)
    k_lstm = 1.0 / jnp.sqrt(jnp.float32(H))
    k_lin = 1.0 / jnp.sqrt(jnp.float32(2 * H))

    def u(k, shape, scale):
        return jax.random.uniform(k, shape, jnp.float32, -scale, scale)

    return dict(
        wih_f=u(ks[0], (I, 4 * H), k_lstm),
        whh_f=u(ks[1], (H, 4 * H), k_lstm),
        b_f=(u(ks[2], (1, 4 * H), k_lstm) + u(ks[3], (1, 4 * H), k_lstm)),
        wih_b=u(ks[4], (I, 4 * H), k_lstm),
        whh_b=u(ks[5], (H, 4 * H), k_lstm),
        b_b=(u(ks[6], (1, 4 * H), k_lstm) + u(ks[7], (1, 4 * H), k_lstm)),
        wmu=u(ks[8], (2 * H, Z), k_lin),
        bmu=u(ks[9], (1, Z), k_lin),
        wsig=u(ks[10], (2 * H, Z), k_lin),
        bsig=u(ks[11], (1, Z), k_lin),
    )


def _pack_bilstm_weights(wih_f, whh_f, b_f, wih_b, whh_b, b_b):
    """Pack per-direction PyTorch-layout weights into the fused kernel layout.

    Kernel layout: gate order [i, f, o, g]; within each gate the first H
    columns are the forward direction and the next H are the backward
    direction. Hidden/input weights are block-diagonal so one matmul drives
    both directions.
    """
    I = wih_f.shape[0]
    H = whh_f.shape[0]
    perm = (0, 1, 3, 2)  # kernel gates [i, f, o, g] -> PyTorch indices [i, f, g, o]

    w_in = jnp.zeros((2 * I, 8 * H), jnp.float32)
    w_hh = jnp.zeros((2 * H, 8 * H), jnp.float32)
    b = jnp.zeros((1, 8 * H), jnp.float32)

    for gk, pk in enumerate(perm):
        c0 = gk * 2 * H
        w_in = w_in.at[0:I, c0:c0 + H].set(wih_f[:, pk * H:(pk + 1) * H])
        w_in = w_in.at[I:2 * I, c0 + H:c0 + 2 * H].set(wih_b[:, pk * H:(pk + 1) * H])
        w_hh = w_hh.at[0:H, c0:c0 + H].set(whh_f[:, pk * H:(pk + 1) * H])
        w_hh = w_hh.at[H:2 * H, c0 + H:c0 + 2 * H].set(whh_b[:, pk * H:(pk + 1) * H])
        b = b.at[:, c0:c0 + H].set(b_f[:, pk * H:(pk + 1) * H])
        b = b.at[:, c0 + H:c0 + 2 * H].set(b_b[:, pk * H:(pk + 1) * H])
    return w_in, w_hh, b


# ----------------------------------------------------------------------------- wrapper
@jax.jit
def encoder_forward(x, params, eps):
    """x: (B, T, 5) batch-first (PyTorch convention). Returns (z, mu, sigma_hat)."""
    B, T, I = x.shape
    Z = params["bmu"].shape[-1]

    w_in, w_hh, b_in = _pack_bilstm_weights(
        params["wih_f"], params["whh_f"], params["b_f"],
        params["wih_b"], params["whh_b"], params["b_b"],
    )
    w_head = jnp.concatenate([params["wmu"], params["wsig"]], axis=1)   # (2H, 2Z)
    b_head = jnp.concatenate([params["bmu"], params["bsig"]], axis=1)   # (1, 2Z)

    # Pair step-s inputs of both directions: row t*B+b = [x[t,b] | x[T-1-t,b]].
    x_tm = jnp.transpose(x, (1, 0, 2)).astype(jnp.float32)              # (T, B, I)
    xx = jnp.concatenate([x_tm, x_tm[::-1]], axis=-1).reshape(T * B, 2 * I)

    vmem = pl.BlockSpec(memory_space=pltpu.MemorySpace.VMEM)
    out = pl.pallas_call(
        encoder_kernel,
        out_shape=jax.ShapeDtypeStruct((3, B, Z), jnp.float32),
        in_specs=[vmem] * 7,
        out_specs=vmem,
    )(xx, w_in, b_in, w_hh, w_head, b_head, eps)

    return out[0], out[1], out[2]


# ----------------------------------------------------------------------------- reference
def encoder_reference(x, params, eps):
    """Pure-JAX reference matching the PyTorch module semantics."""
    B, T, _ = x.shape
    H = params["whh_f"].shape[0]
    hp = jax.lax.Precision.HIGHEST

    def lstm(x_seq, wih, whh, b):
        def step(carry, xt):
            h, c = carry
            gates = (jnp.dot(xt, wih, precision=hp)
                     + jnp.dot(h, whh, precision=hp) + b)
            i = jax.nn.sigmoid(gates[:, 0 * H:1 * H])
            f = jax.nn.sigmoid(gates[:, 1 * H:2 * H])
            g = jnp.tanh(gates[:, 2 * H:3 * H])
            o = jax.nn.sigmoid(gates[:, 3 * H:4 * H])
            c = f * c + i * g
            h = o * jnp.tanh(c)
            return (h, c), None

        init = (jnp.zeros((B, H), jnp.float32), jnp.zeros((B, H), jnp.float32))
        (h, _), _ = jax.lax.scan(step, init, x_seq)
        return h

    x_tm = jnp.transpose(x, (1, 0, 2)).astype(jnp.float32)
    h_f = lstm(x_tm, params["wih_f"], params["whh_f"], params["b_f"])
    h_b = lstm(x_tm[::-1], params["wih_b"], params["whh_b"], params["b_b"])
    y = jnp.concatenate([h_f, h_b], axis=1)
    mu = jnp.dot(y, params["wmu"], precision=hp) + params["bmu"]
    sigma_hat = jnp.dot(y, params["wsig"], precision=hp) + params["bsig"]
    z = mu + jnp.exp(sigma_hat * 0.5) * eps
    return z, mu, sigma_hat


# ----------------------------------------------------------------------------- main
if __name__ == "__main__":
    B, T, F = 2, 8, 5
    hidden_size, z_dims = 32, 16

    key = jax.random.PRNGKey(0)
    k_x, k_p, k_eps = jax.random.split(key, 3)

    x = jax.random.normal(k_x, (B, T, F), jnp.float32)
    params = init_encoder_params(k_p, hidden_size, z_dims, input_size=F)
    eps = jax.random.normal(k_eps, (B, z_dims), jnp.float32)

    z, mu, sigma_hat = encoder_forward(x, params, eps)
    jax.block_until_ready((z, mu, sigma_hat))

    z_r, mu_r, sh_r = encoder_reference(x, params, eps)
    np.testing.assert_allclose(np.asarray(mu), np.asarray(mu_r), rtol=2e-2, atol=2e-2)
    np.testing.assert_allclose(np.asarray(sigma_hat), np.asarray(sh_r), rtol=2e-2, atol=2e-2)
    np.testing.assert_allclose(np.asarray(z), np.asarray(z_r), rtol=2e-2, atol=2e-2)

    assert z.shape == (B, z_dims) and mu.shape == (B, z_dims) and sigma_hat.shape == (B, z_dims)
    print("KERNEL_OK")
</pallas_src>

<mosaic_0001>
module attributes {stable_mosaic.version = 11 : i64} {
  func.func @encoder_kernel(%arg0: memref<16x10xf32, #tpu.memory_space<vmem>>, %arg1: memref<10x256xf32, #tpu.memory_space<vmem>>, %arg2: memref<1x256xf32, #tpu.memory_space<vmem>>, %arg3: memref<64x256xf32, #tpu.memory_space<vmem>>, %arg4: memref<64x32xf32, #tpu.memory_space<vmem>>, %arg5: memref<1x32xf32, #tpu.memory_space<vmem>>, %arg6: memref<2x16xf32, #tpu.memory_space<vmem>>, %arg7: memref<3x2x16xf32, #tpu.memory_space<vmem>>) attributes {dimension_semantics = [], scalar_prefetch = 0 : i64, scratch_operands = 0 : i64, tpu.core_type = #tpu.core_type<tc>} {
    %c0 = arith.constant 0 : index
    %c0_0 = arith.constant 0 : index
    %0 = vector.load %arg0[%c0, %c0_0] : memref<16x10xf32, #tpu.memory_space<vmem>>, vector<16x10xf32>
    %c0_1 = arith.constant 0 : index
    %c0_2 = arith.constant 0 : index
    %1 = vector.load %arg1[%c0_1, %c0_2] : memref<10x256xf32, #tpu.memory_space<vmem>>, vector<10x256xf32>
    %cst = arith.constant dense<0.000000e+00> : vector<16x256xf32>
    %2 = tpu.matmul %0, %1, %cst {dimension_numbers = #tpu.dot_dimension_numbers<[1], [0], [0], [1], [0, 0, 1, 1], [], []>} : vector<16x10xf32>, vector<10x256xf32>, vector<16x256xf32> -> vector<16x256xf32>
    %c0_3 = arith.constant 0 : index
    %c0_4 = arith.constant 0 : index
    %3 = vector.load %arg2[%c0_3, %c0_4] : memref<1x256xf32, #tpu.memory_space<vmem>>, vector<1x256xf32>
    %4 = vector.broadcast %3 : vector<1x256xf32> to vector<16x256xf32>
    %5 = arith.addf %2, %4 : vector<16x256xf32>
    %c0_5 = arith.constant 0 : index
    %c0_6 = arith.constant 0 : index
    %6 = vector.load %arg3[%c0_5, %c0_6] : memref<64x256xf32, #tpu.memory_space<vmem>>, vector<64x256xf32>
    %cst_7 = arith.constant 0.000000e+00 : f32
    %7 = vector.broadcast %cst_7 : f32 to vector<2x64xf32>
    %cst_8 = arith.constant 0.000000e+00 : f32
    %8 = vector.broadcast %cst_8 : f32 to vector<2x64xf32>
    %9 = vector.extract_strided_slice %5 {offsets = [0, 0], sizes = [2, 256], strides = [1, 1]} : vector<16x256xf32> to vector<2x256xf32>
    %cst_9 = arith.constant dense<0.000000e+00> : vector<2x256xf32>
    %10 = tpu.matmul %7, %6, %cst_9 {dimension_numbers = #tpu.dot_dimension_numbers<[1], [0], [0], [1], [0, 0, 1, 1], [], []>} : vector<2x64xf32>, vector<64x256xf32>, vector<2x256xf32> -> vector<2x256xf32>
    %11 = arith.addf %9, %10 : vector<2x256xf32>
    %12 = vector.extract_strided_slice %11 {offsets = [0, 0], sizes = [2, 192], strides = [1, 1]} : vector<2x256xf32> to vector<2x192xf32>
    %13 = arith.negf %12 : vector<2x192xf32>
    %14 = math.exp %13 : vector<2x192xf32>
    %cst_10 = arith.constant 1.000000e+00 : f32
    %15 = vector.broadcast %cst_10 : f32 to vector<2x192xf32>
    %16 = arith.addf %15, %14 : vector<2x192xf32>
    %17 = arith.divf %15, %16 : vector<2x192xf32>
    %18 = vector.extract_strided_slice %11 {offsets = [0, 192], sizes = [2, 64], strides = [1, 1]} : vector<2x256xf32> to vector<2x64xf32>
    %19 = math.tanh %18 : vector<2x64xf32>
    %20 = vector.extract_strided_slice %17 {offsets = [0, 0], sizes = [2, 64], strides = [1, 1]} : vector<2x192xf32> to vector<2x64xf32>
    %21 = vector.extract_strided_slice %17 {offsets = [0, 64], sizes = [2, 64], strides = [1, 1]} : vector<2x192xf32> to vector<2x64xf32>
    %22 = vector.extract_strided_slice %17 {offsets = [0, 128], sizes = [2, 64], strides = [1, 1]} : vector<2x192xf32> to vector<2x64xf32>
    %23 = arith.mulf %21, %8 : vector<2x64xf32>
    %24 = arith.mulf %20, %19 : vector<2x64xf32>
    %25 = arith.addf %23, %24 : vector<2x64xf32>
    %26 = math.tanh %25 : vector<2x64xf32>
    %27 = arith.mulf %22, %26 : vector<2x64xf32>
    %28 = vector.extract_strided_slice %5 {offsets = [2, 0], sizes = [2, 256], strides = [1, 1]} : vector<16x256xf32> to vector<2x256xf32>
    %cst_11 = arith.constant dense<0.000000e+00> : vector<2x256xf32>
    %29 = tpu.matmul %27, %6, %cst_11 {dimension_numbers = #tpu.dot_dimension_numbers<[1], [0], [0], [1], [0, 0, 1, 1], [], []>} : vector<2x64xf32>, vector<64x256xf32>, vector<2x256xf32> -> vector<2x256xf32>
    %30 = arith.addf %28, %29 : vector<2x256xf32>
    %31 = vector.extract_strided_slice %30 {offsets = [0, 0], sizes = [2, 192], strides = [1, 1]} : vector<2x256xf32> to vector<2x192xf32>
    %32 = arith.negf %31 : vector<2x192xf32>
    %33 = math.exp %32 : vector<2x192xf32>
    %cst_12 = arith.constant 1.000000e+00 : f32
    %34 = vector.broadcast %cst_12 : f32 to vector<2x192xf32>
    %35 = arith.addf %34, %33 : vector<2x192xf32>
    %36 = arith.divf %34, %35 : vector<2x192xf32>
    %37 = vector.extract_strided_slice %30 {offsets = [0, 192], sizes = [2, 64], strides = [1, 1]} : vector<2x256xf32> to vector<2x64xf32>
    %38 = math.tanh %37 : vector<2x64xf32>
    %39 = vector.extract_strided_slice %36 {offsets = [0, 0], sizes = [2, 64], strides = [1, 1]} : vector<2x192xf32> to vector<2x64xf32>
    %40 = vector.extract_strided_slice %36 {offsets = [0, 64], sizes = [2, 64], strides = [1, 1]} : vector<2x192xf32> to vector<2x64xf32>
    %41 = vector.extract_strided_slice %36 {offsets = [0, 128], sizes = [2, 64], strides = [1, 1]} : vector<2x192xf32> to vector<2x64xf32>
    %42 = arith.mulf %40, %25 : vector<2x64xf32>
    %43 = arith.mulf %39, %38 : vector<2x64xf32>
    %44 = arith.addf %42, %43 : vector<2x64xf32>
    %45 = math.tanh %44 : vector<2x64xf32>
    %46 = arith.mulf %41, %45 : vector<2x64xf32>
    %47 = vector.extract_strided_slice %5 {offsets = [4, 0], sizes = [2, 256], strides = [1, 1]} : vector<16x256xf32> to vector<2x256xf32>
    %cst_13 = arith.constant dense<0.000000e+00> : vector<2x256xf32>
    %48 = tpu.matmul %46, %6, %cst_13 {dimension_numbers = #tpu.dot_dimension_numbers<[1], [0], [0], [1], [0, 0, 1, 1], [], []>} : vector<2x64xf32>, vector<64x256xf32>, vector<2x256xf32> -> vector<2x256xf32>
    %49 = arith.addf %47, %48 : vector<2x256xf32>
    %50 = vector.extract_strided_slice %49 {offsets = [0, 0], sizes = [2, 192], strides = [1, 1]} : vector<2x256xf32> to vector<2x192xf32>
    %51 = arith.negf %50 : vector<2x192xf32>
    %52 = math.exp %51 : vector<2x192xf32>
    %cst_14 = arith.constant 1.000000e+00 : f32
    %53 = vector.broadcast %cst_14 : f32 to vector<2x192xf32>
    %54 = arith.addf %53, %52 : vector<2x192xf32>
    %55 = arith.divf %53, %54 : vector<2x192xf32>
    %56 = vector.extract_strided_slice %49 {offsets = [0, 192], sizes = [2, 64], strides = [1, 1]} : vector<2x256xf32> to vector<2x64xf32>
    %57 = math.tanh %56 : vector<2x64xf32>
    %58 = vector.extract_strided_slice %55 {offsets = [0, 0], sizes = [2, 64], strides = [1, 1]} : vector<2x192xf32> to vector<2x64xf32>
    %59 = vector.extract_strided_slice %55 {offsets = [0, 64], sizes = [2, 64], strides = [1, 1]} : vector<2x192xf32> to vector<2x64xf32>
    %60 = vector.extract_strided_slice %55 {offsets = [0, 128], sizes = [2, 64], strides = [1, 1]} : vector<2x192xf32> to vector<2x64xf32>
    %61 = arith.mulf %59, %44 : vector<2x64xf32>
    %62 = arith.mulf %58, %57 : vector<2x64xf32>
    %63 = arith.addf %61, %62 : vector<2x64xf32>
    %64 = math.tanh %63 : vector<2x64xf32>
    %65 = arith.mulf %60, %64 : vector<2x64xf32>
    %66 = vector.extract_strided_slice %5 {offsets = [6, 0], sizes = [2, 256], strides = [1, 1]} : vector<16x256xf32> to vector<2x256xf32>
    %cst_15 = arith.constant dense<0.000000e+00> : vector<2x256xf32>
    %67 = tpu.matmul %65, %6, %cst_15 {dimension_numbers = #tpu.dot_dimension_numbers<[1], [0], [0], [1], [0, 0, 1, 1], [], []>} : vector<2x64xf32>, vector<64x256xf32>, vector<2x256xf32> -> vector<2x256xf32>
    %68 = arith.addf %66, %67 : vector<2x256xf32>
    %69 = vector.extract_strided_slice %68 {offsets = [0, 0], sizes = [2, 192], strides = [1, 1]} : vector<2x256xf32> to vector<2x192xf32>
    %70 = arith.negf %69 : vector<2x192xf32>
    %71 = math.exp %70 : vector<2x192xf32>
    %cst_16 = arith.constant 1.000000e+00 : f32
    %72 = vector.broadcast %cst_16 : f32 to vector<2x192xf32>
    %73 = arith.addf %72, %71 : vector<2x192xf32>
    %74 = arith.divf %72, %73 : vector<2x192xf32>
    %75 = vector.extract_strided_slice %68 {offsets = [0, 192], sizes = [2, 64], strides = [1, 1]} : vector<2x256xf32> to vector<2x64xf32>
    %76 = math.tanh %75 : vector<2x64xf32>
    %77 = vector.extract_strided_slice %74 {offsets = [0, 0], sizes = [2, 64], strides = [1, 1]} : vector<2x192xf32> to vector<2x64xf32>
    %78 = vector.extract_strided_slice %74 {offsets = [0, 64], sizes = [2, 64], strides = [1, 1]} : vector<2x192xf32> to vector<2x64xf32>
    %79 = vector.extract_strided_slice %74 {offsets = [0, 128], sizes = [2, 64], strides = [1, 1]} : vector<2x192xf32> to vector<2x64xf32>
    %80 = arith.mulf %78, %63 : vector<2x64xf32>
    %81 = arith.mulf %77, %76 : vector<2x64xf32>
    %82 = arith.addf %80, %81 : vector<2x64xf32>
    %83 = math.tanh %82 : vector<2x64xf32>
    %84 = arith.mulf %79, %83 : vector<2x64xf32>
    %85 = vector.extract_strided_slice %5 {offsets = [8, 0], sizes = [2, 256], strides = [1, 1]} : vector<16x256xf32> to vector<2x256xf32>
    %cst_17 = arith.constant dense<0.000000e+00> : vector<2x256xf32>
    %86 = tpu.matmul %84, %6, %cst_17 {dimension_numbers = #tpu.dot_dimension_numbers<[1], [0], [0], [1], [0, 0, 1, 1], [], []>} : vector<2x64xf32>, vector<64x256xf32>, vector<2x256xf32> -> vector<2x256xf32>
    %87 = arith.addf %85, %86 : vector<2x256xf32>
    %88 = vector.extract_strided_slice %87 {offsets = [0, 0], sizes = [2, 192], strides = [1, 1]} : vector<2x256xf32> to vector<2x192xf32>
    %89 = arith.negf %88 : vector<2x192xf32>
    %90 = math.exp %89 : vector<2x192xf32>
    %cst_18 = arith.constant 1.000000e+00 : f32
    %91 = vector.broadcast %cst_18 : f32 to vector<2x192xf32>
    %92 = arith.addf %91, %90 : vector<2x192xf32>
    %93 = arith.divf %91, %92 : vector<2x192xf32>
    %94 = vector.extract_strided_slice %87 {offsets = [0, 192], sizes = [2, 64], strides = [1, 1]} : vector<2x256xf32> to vector<2x64xf32>
    %95 = math.tanh %94 : vector<2x64xf32>
    %96 = vector.extract_strided_slice %93 {offsets = [0, 0], sizes = [2, 64], strides = [1, 1]} : vector<2x192xf32> to vector<2x64xf32>
    %97 = vector.extract_strided_slice %93 {offsets = [0, 64], sizes = [2, 64], strides = [1, 1]} : vector<2x192xf32> to vector<2x64xf32>
    %98 = vector.extract_strided_slice %93 {offsets = [0, 128], sizes = [2, 64], strides = [1, 1]} : vector<2x192xf32> to vector<2x64xf32>
    %99 = arith.mulf %97, %82 : vector<2x64xf32>
    %100 = arith.mulf %96, %95 : vector<2x64xf32>
    %101 = arith.addf %99, %100 : vector<2x64xf32>
    %102 = math.tanh %101 : vector<2x64xf32>
    %103 = arith.mulf %98, %102 : vector<2x64xf32>
    %104 = vector.extract_strided_slice %5 {offsets = [10, 0], sizes = [2, 256], strides = [1, 1]} : vector<16x256xf32> to vector<2x256xf32>
    %cst_19 = arith.constant dense<0.000000e+00> : vector<2x256xf32>
    %105 = tpu.matmul %103, %6, %cst_19 {dimension_numbers = #tpu.dot_dimension_numbers<[1], [0], [0], [1], [0, 0, 1, 1], [], []>} : vector<2x64xf32>, vector<64x256xf32>, vector<2x256xf32> -> vector<2x256xf32>
    %106 = arith.addf %104, %105 : vector<2x256xf32>
    %107 = vector.extract_strided_slice %106 {offsets = [0, 0], sizes = [2, 192], strides = [1, 1]} : vector<2x256xf32> to vector<2x192xf32>
    %108 = arith.negf %107 : vector<2x192xf32>
    %109 = math.exp %108 : vector<2x192xf32>
    %cst_20 = arith.constant 1.000000e+00 : f32
    %110 = vector.broadcast %cst_20 : f32 to vector<2x192xf32>
    %111 = arith.addf %110, %109 : vector<2x192xf32>
    %112 = arith.divf %110, %111 : vector<2x192xf32>
    %113 = vector.extract_strided_slice %106 {offsets = [0, 192], sizes = [2, 64], strides = [1, 1]} : vector<2x256xf32> to vector<2x64xf32>
    %114 = math.tanh %113 : vector<2x64xf32>
    %115 = vector.extract_strided_slice %112 {offsets = [0, 0], sizes = [2, 64], strides = [1, 1]} : vector<2x192xf32> to vector<2x64xf32>
    %116 = vector.extract_strided_slice %112 {offsets = [0, 64], sizes = [2, 64], strides = [1, 1]} : vector<2x192xf32> to vector<2x64xf32>
    %117 = vector.extract_strided_slice %112 {offsets = [0, 128], sizes = [2, 64], strides = [1, 1]} : vector<2x192xf32> to vector<2x64xf32>
    %118 = arith.mulf %116, %101 : vector<2x64xf32>
    %119 = arith.mulf %115, %114 : vector<2x64xf32>
    %120 = arith.addf %118, %119 : vector<2x64xf32>
    %121 = math.tanh %120 : vector<2x64xf32>
    %122 = arith.mulf %117, %121 : vector<2x64xf32>
    %123 = vector.extract_strided_slice %5 {offsets = [12, 0], sizes = [2, 256], strides = [1, 1]} : vector<16x256xf32> to vector<2x256xf32>
    %cst_21 = arith.constant dense<0.000000e+00> : vector<2x256xf32>
    %124 = tpu.matmul %122, %6, %cst_21 {dimension_numbers = #tpu.dot_dimension_numbers<[1], [0], [0], [1], [0, 0, 1, 1], [], []>} : vector<2x64xf32>, vector<64x256xf32>, vector<2x256xf32> -> vector<2x256xf32>
    %125 = arith.addf %123, %124 : vector<2x256xf32>
    %126 = vector.extract_strided_slice %125 {offsets = [0, 0], sizes = [2, 192], strides = [1, 1]} : vector<2x256xf32> to vector<2x192xf32>
    %127 = arith.negf %126 : vector<2x192xf32>
    %128 = math.exp %127 : vector<2x192xf32>
    %cst_22 = arith.constant 1.000000e+00 : f32
    %129 = vector.broadcast %cst_22 : f32 to vector<2x192xf32>
    %130 = arith.addf %129, %128 : vector<2x192xf32>
    %131 = arith.divf %129, %130 : vector<2x192xf32>
    %132 = vector.extract_strided_slice %125 {offsets = [0, 192], sizes = [2, 64], strides = [1, 1]} : vector<2x256xf32> to vector<2x64xf32>
    %133 = math.tanh %132 : vector<2x64xf32>
    %134 = vector.extract_strided_slice %131 {offsets = [0, 0], sizes = [2, 64], strides = [1, 1]} : vector<2x192xf32> to vector<2x64xf32>
    %135 = vector.extract_strided_slice %131 {offsets = [0, 64], sizes = [2, 64], strides = [1, 1]} : vector<2x192xf32> to vector<2x64xf32>
    %136 = vector.extract_strided_slice %131 {offsets = [0, 128], sizes = [2, 64], strides = [1, 1]} : vector<2x192xf32> to vector<2x64xf32>
    %137 = arith.mulf %135, %120 : vector<2x64xf32>
    %138 = arith.mulf %134, %133 : vector<2x64xf32>
    %139 = arith.addf %137, %138 : vector<2x64xf32>
    %140 = math.tanh %139 : vector<2x64xf32>
    %141 = arith.mulf %136, %140 : vector<2x64xf32>
    %142 = vector.extract_strided_slice %5 {offsets = [14, 0], sizes = [2, 256], strides = [1, 1]} : vector<16x256xf32> to vector<2x256xf32>
    %cst_23 = arith.constant dense<0.000000e+00> : vector<2x256xf32>
    %143 = tpu.matmul %141, %6, %cst_23 {dimension_numbers = #tpu.dot_dimension_numbers<[1], [0], [0], [1], [0, 0, 1, 1], [], []>} : vector<2x64xf32>, vector<64x256xf32>, vector<2x256xf32> -> vector<2x256xf32>
    %144 = arith.addf %142, %143 : vector<2x256xf32>
    %145 = vector.extract_strided_slice %144 {offsets = [0, 0], sizes = [2, 192], strides = [1, 1]} : vector<2x256xf32> to vector<2x192xf32>
    %146 = arith.negf %145 : vector<2x192xf32>
    %147 = math.exp %146 : vector<2x192xf32>
    %cst_24 = arith.constant 1.000000e+00 : f32
    %148 = vector.broadcast %cst_24 : f32 to vector<2x192xf32>
    %149 = arith.addf %148, %147 : vector<2x192xf32>
    %150 = arith.divf %148, %149 : vector<2x192xf32>
    %151 = vector.extract_strided_slice %144 {offsets = [0, 192], sizes = [2, 64], strides = [1, 1]} : vector<2x256xf32> to vector<2x64xf32>
    %152 = math.tanh %151 : vector<2x64xf32>
    %153 = vector.extract_strided_slice %150 {offsets = [0, 0], sizes = [2, 64], strides = [1, 1]} : vector<2x192xf32> to vector<2x64xf32>
    %154 = vector.extract_strided_slice %150 {offsets = [0, 64], sizes = [2, 64], strides = [1, 1]} : vector<2x192xf32> to vector<2x64xf32>
    %155 = vector.extract_strided_slice %150 {offsets = [0, 128], sizes = [2, 64], strides = [1, 1]} : vector<2x192xf32> to vector<2x64xf32>
    %156 = arith.mulf %154, %139 : vector<2x64xf32>
    %157 = arith.mulf %153, %152 : vector<2x64xf32>
    %158 = arith.addf %156, %157 : vector<2x64xf32>
    %159 = math.tanh %158 : vector<2x64xf32>
    %160 = arith.mulf %155, %159 : vector<2x64xf32>
    %c0_25 = arith.constant 0 : index
    %c0_26 = arith.constant 0 : index
    %161 = vector.load %arg4[%c0_25, %c0_26] : memref<64x32xf32, #tpu.memory_space<vmem>>, vector<64x32xf32>
    %cst_27 = arith.constant dense<0.000000e+00> : vector<2x32xf32>
    %162 = tpu.matmul %160, %161, %cst_27 {dimension_numbers = #tpu.dot_dimension_numbers<[1], [0], [0], [1], [0, 0, 1, 1], [], []>} : vector<2x64xf32>, vector<64x32xf32>, vector<2x32xf32> -> vector<2x32xf32>
    %c0_28 = arith.constant 0 : index
    %c0_29 = arith.constant 0 : index
    %163 = vector.load %arg5[%c0_28, %c0_29] : memref<1x32xf32, #tpu.memory_space<vmem>>, vector<1x32xf32>
    %164 = vector.broadcast %163 : vector<1x32xf32> to vector<2x32xf32>
    %165 = arith.addf %162, %164 : vector<2x32xf32>
    %166 = vector.extract_strided_slice %165 {offsets = [0, 0], sizes = [2, 16], strides = [1, 1]} : vector<2x32xf32> to vector<2x16xf32>
    %167 = vector.extract_strided_slice %165 {offsets = [0, 16], sizes = [2, 16], strides = [1, 1]} : vector<2x32xf32> to vector<2x16xf32>
    %cst_30 = arith.constant 5.000000e-01 : f32
    %168 = vector.broadcast %cst_30 : f32 to vector<2x16xf32>
    %169 = arith.mulf %167, %168 : vector<2x16xf32>
    %170 = math.exp %169 : vector<2x16xf32>
    %c0_31 = arith.constant 0 : index
    %c0_32 = arith.constant 0 : index
    %171 = vector.load %arg6[%c0_31, %c0_32] : memref<2x16xf32, #tpu.memory_space<vmem>>, vector<2x16xf32>
    %172 = arith.mulf %170, %171 : vector<2x16xf32>
    %173 = arith.addf %166, %172 : vector<2x16xf32>
    %c0_33 = arith.constant 0 : index
    %c0_34 = arith.constant 0 : index
    %c0_35 = arith.constant 0 : index
    %174 = vector.load %arg7[%c0_33, %c0_34, %c0_35] : memref<3x2x16xf32, #tpu.memory_space<vmem>>, vector<1x2x16xf32>
    %175 = vector.shape_cast %174 : vector<1x2x16xf32> to vector<2x16xf32>
    %176 = vector.shape_cast %173 : vector<2x16xf32> to vector<1x2x16xf32>
    tpu.vector_store %arg7[%c0_33, %c0_34, %c0_35], %176 {strides = array<i32>} : memref<3x2x16xf32, #tpu.memory_space<vmem>>, vector<1x2x16xf32>,
    %c1 = arith.constant 1 : index
    %c0_36 = arith.constant 0 : index
    %c0_37 = arith.constant 0 : index
    %177 = vector.load %arg7[%c1, %c0_36, %c0_37] : memref<3x2x16xf32, #tpu.memory_space<vmem>>, vector<1x2x16xf32>
    %178 = vector.shape_cast %177 : vector<1x2x16xf32> to vector<2x16xf32>
    %179 = vector.shape_cast %166 : vector<2x16xf32> to vector<1x2x16xf32>
    tpu.vector_store %arg7[%c1, %c0_36, %c0_37], %179 {strides = array<i32>} : memref<3x2x16xf32, #tpu.memory_space<vmem>>, vector<1x2x16xf32>,
    %c2 = arith.constant 2 : index
    %c0_38 = arith.constant 0 : index
    %c0_39 = arith.constant 0 : index
    %180 = vector.load %arg7[%c2, %c0_38, %c0_39] : memref<3x2x16xf32, #tpu.memory_space<vmem>>, vector<1x2x16xf32>
    %181 = vector.shape_cast %180 : vector<1x2x16xf32> to vector<2x16xf32>
    %182 = vector.shape_cast %167 : vector<2x16xf32> to vector<1x2x16xf32>
    tpu.vector_store %arg7[%c2, %c0_38, %c0_39], %182 {strides = array<i32>} : memref<3x2x16xf32, #tpu.memory_space<vmem>>, vector<1x2x16xf32>,
    return
  }
}

</mosaic_0001>

<bundles_post_ra>
// kernel: encoder_forward.1
= control target key start
LH: loop header
LB: loop body
LE: loop exit
PB: predicated region body
PF: predicated region fallthrough
CT: control target
= control target key end

     0   :  { %vm51_vm0 = vcmask 1041408   ;;  %v1341_v3 = vmov 0.0   ;;  %vm44_vm1 = vcmask 80896   ;;  %v34_v22 = vlaneseq  ;;  %s1342_s20 = smov 64   ;;  %s1344_s15 = smov 16   ;;  %s1751_s3 = inlined_call_operand.vmem [shape: f32[64,256], index: 3, kind: input, shape index: {}]   ;;  %s1752_s1 = inlined_call_operand.vmem [shape: f32[10,256], index: 1, kind: input, shape index: {}]   ;;  %s1753_s0 = inlined_call_operand.vmem [shape: f32[16,10], index: 0, kind: input, shape index: {}]   ;;  %s1754_s2 = inlined_call_operand.vmem [shape: f32[1,256], index: 2, kind: input, shape index: {}]   ;;  %s1755_s4 = inlined_call_operand.vmem [shape: f32[64,32], index: 4, kind: input, shape index: {}]   ;;  %s1756_s6 = inlined_call_operand.vmem [shape: f32[2,16], index: 6, kind: input, shape index: {}]   ;;  %s1757_s5 = inlined_call_operand.vmem [shape: f32[1,32], index: 5, kind: input, shape index: {}]   ;;  %s1758_s7 = inlined_call_operand.vmem [shape: f32[3,2,16], index: 7, kind: output, shape index: {}]  }
   0x1   :  { %v1389_v0 = vld [vmem:[%s1751_s3 + $0x78] sm:$0xff]  ;;  %v1394_v1 = vld [vmem:[%s1751_s3 + $0x70] sm:$0xff]  ;;  %v1399_v2 = vld [vmem:[%s1751_s3 + $0x68] sm:$0xff]  ;;  %122 = vmatprep.mubr.f32.mxu0 %v1341_v3  ;;  %219 = vmatprep.mubr.f32.mxu1 %v1341_v3  ;;  %vm151_vm2 = vcmask 523264   ;;  %vm1343_vm3 = vmmov 0   ;;  %vm1165_vm4 = vcmask 123904  }
   0x2   :  { %171 = vmatprep.subr.mxu1 %v1389_v0  ;;  %v1407_v4 = vld [vmem:[%s1751_s3 + $0x60] sm:$0xff]  ;;  %v1413_v5 = vld [vmem:[%s1751_s3 + $0x58] sm:$0xff]  ;;  %v1422_v7 = vld [vmem:[%s1751_s3 + $0x50] sm:$0xff]  ;;  %v35_v23 = vshrl.u32 %v34_v22, 7 }
   0x3   :  { %172 = vmatpush1.msra.mxu1 %v1394_v1  ;;  %v31_v6 = vld [vmem:[%s1752_s1 + $0x18] sm:$0x3]  ;;  %v30_v8 = vld [vmem:[%s1752_s1 + $0x10] sm:$0x3]  ;;  %v1432_v9 = vld [vmem:[%s1751_s3 + $0x48] sm:$0xff] }
   0x4   :  { %173 = vmatprep.subr.mxu1 %v1399_v2  ;;  %1179 = vmatprep.subr.msk.mxu0 %vm51_vm0, %v31_v6  ;;  %v29_v10 = vld [vmem:[%s1752_s1 + $0x8] sm:$0xff]  ;;  %v28_v11 = vld [vmem:[%s1752_s1] sm:$0xff]  ;;  %v1454_v14 = vld [vmem:[%s1751_s3 + $0x38] sm:$0xff]  ;;  %v40_v24 = vsub.s32 1, %v35_v23  ;;  %v36_v34 = vsub.s32 0, %v35_v23 }
   0x5   :  { %174 = vmatpush1.msra.mxu1 %v1407_v4  ;;  %1180 = vmatpush1.msk.msra.mxu0 %vm51_vm0, %v30_v8  ;;  %v1445_v12 = vld [vmem:[%s1751_s3 + $0x40] sm:$0xff]  ;;  %v1460_v15 = vld [vmem:[%s1751_s3 + $0x30] sm:$0xff]  ;;  %v1467_v16 = vld [vmem:[%s1751_s3 + $0x28] sm:$0xff] }
   0x6   :  { %175 = vmatprep.subr.mxu1 %v1413_v5  ;;  %88 = vmatprep.subr.mxu0 %v29_v10  ;;  %v26_v13 = vld [vmem:[%s1753_s0] sm:$0xff]  ;;  %v1481_v18 = vld [vmem:[%s1751_s3 + $0x18] sm:$0xff]  ;;  %v1488_v19 = vld [vmem:[%s1751_s3 + $0x10] sm:$0xff] }
   0x7   :  { %176 = vmatpush1.msra.mxu1 %v1422_v7  ;;  %89 = vmatpush1.msra.mxu0 %v28_v11  ;;  %v1474_v17 = vld [vmem:[%s1751_s3 + $0x20] sm:$0xff]  ;;  %v1495_v20 = vld [vmem:[%s1751_s3 + $0x8] sm:$0xff] }
   0x8   :  { %177 = vmatprep.subr.mxu1 %v1432_v9  ;;  %1181 = vmatmul.mubr.msk.f32.vlgmr.msra.gmra.mxu0 %vm44_vm1, %v26_v13  ;;  %v1502_v21 = vld [vmem:[%s1751_s3] sm:$0xff]  ;;  %v27_v44 = vld [vmem:[%s1753_s0 + $0x8] sm:$0xff] }
   0x9   :  { %178 = vmatpush1.msra.mxu1 %v1445_v12  ;;  %277 = vmatprep.subr.mxu0 %v1389_v0  ;;  %v32_v25 = vld [vmem:[%s1754_s2] sm:$0x3] }
   0xa   :  { %179 = vmatprep.subr.mxu1 %v1454_v14  ;;  %278 = vmatpush1.msra.mxu0 %v1394_v1  ;;  %v1542_v27 = vrot.slane %v32_v25, %v40_v24  ;;  %v1549_v35 = vrot.slane %v32_v25, %v36_v34 }
   0xb   :  { %180 = vmatpush1.msra.mxu1 %v1460_v15  ;;  %279 = vmatprep.subr.mxu0 %v1399_v2 }
   0xc   :  { %181 = vmatprep.subr.mxu1 %v1467_v16  ;;  %280 = vmatpush1.msra.mxu0 %v1407_v4 }
   0xd   :  { %182 = vmatpush1.msra.mxu1 %v1474_v17  ;;  %281 = vmatprep.subr.mxu0 %v1413_v5 }
   0xe   :  { %183 = vmatprep.subr.mxu1 %v1481_v18  ;;  %282 = vmatpush1.msra.mxu0 %v1422_v7 }
   0xf   :  { %184 = vmatpush1.msra.mxu1 %v1488_v19  ;;  %283 = vmatprep.subr.mxu0 %v1432_v9 }
  0x10   :  { %185 = vmatprep.subr.mxu1 %v1495_v20  ;;  %284 = vmatpush1.msra.mxu0 %v1445_v12 }
  0x11   :  { %186 = vmatpush1.msra.mxu1 %v1502_v21  ;;  %285 = vmatprep.subr.mxu0 %v1454_v14 }
  0x12   :  { %220 = vmatmul.mubr.f32.vlgmr.msra.gmra.mxu1 %v1341_v3  ;;  %128 = vmatprep.mubr.f32.mxu0 %v1341_v3 }
  0x13   :  { %286 = vmatpush1.msra.mxu0 %v1460_v15  ;;  %393 = vmatprep.subr.mxu1 %v1389_v0 }
  0x14   :  { %287 = vmatprep.subr.mxu0 %v1467_v16  ;;  %394 = vmatpush1.msra.mxu1 %v1394_v1 }
  0x15   :  { %288 = vmatpush1.msra.mxu0 %v1474_v17  ;;  %395 = vmatprep.subr.mxu1 %v1399_v2 }
  0x16   :  { %289 = vmatprep.subr.mxu0 %v1481_v18  ;;  %396 = vmatpush1.msra.mxu1 %v1407_v4 }
  0x17   :  { %290 = vmatpush1.msra.mxu0 %v1488_v19  ;;  %397 = vmatprep.subr.mxu1 %v1413_v5 }
  0x18   :  { %291 = vmatprep.subr.mxu0 %v1495_v20  ;;  %398 = vmatpush1.msra.mxu1 %v1422_v7 }
  0x19   :  { %292 = vmatpush1.msra.mxu0 %v1502_v21  ;;  %399 = vmatprep.subr.mxu1 %v1432_v9 }
  0x1a   :  { %400 = vmatpush1.msra.mxu1 %v1445_v12  ;;  %441 = vmatprep.mubr.f32.mxu1 %v1341_v3 }
  0x1b   :  { %401 = vmatprep.subr.mxu1 %v1454_v14  ;;  %509 = vmatprep.subr.mxu0 %v1389_v0 }
  0x1c   :  { %402 = vmatpush1.msra.mxu1 %v1460_v15  ;;  %1182 = vmatmul.mubr.msk.f32.gmra.mxu0 %vm44_vm1, %v27_v44 }
  0x1d   :  { %403 = vmatprep.subr.mxu1 %v1467_v16  ;;  %325 = vmatprep.mubr.f32.mxu0 %v1341_v3 }
  0x1e   :  { %404 = vmatpush1.msra.mxu1 %v1474_v17 }
  0x1f   :  { %405 = vmatprep.subr.mxu1 %v1481_v18 }
  0x20   :  { %406 = vmatpush1.msra.mxu1 %v1488_v19 }
  0x21   :  { %407 = vmatprep.subr.mxu1 %v1495_v20 }
  0x22   :  { %408 = vmatpush1.msra.mxu1 %v1502_v21 }
  0x23   :  { %625 = vmatprep.subr.mxu1 %v1389_v0 }
  0xc8   :  { %v124_v26 = vpop.f32.mrf.mxu0 }
  0xc9   :  { %v1552_v36 = vadd.f32 %v124_v26, %v1549_v35 }
  0xca   :  { %v126_v28 = vpop.f32.mrf.mxu0 }
  0xcb   :  { %v1545_v30 = vadd.f32 %v126_v28, %v1542_v27 }
  0xd2   :  { %v221_v29 = vpop.f32.mrf.mxu1 }
  0xd3   :  { %v226_v37 = vadd.f32 %v221_v29, %v1552_v36 }
  0xd4   :  { %v223_v31 = vpop.f32.mrf.mxu1 }
  0xd5   :  { %v227_v32 = vadd.f32 %v223_v31, %v1545_v30  ;;  %v1183_v38 = vmul.f32 -1.442695, %v226_v37 }
  0xd7   :  { %1243 = vtanh.f32 %v227_v32  ;;  %v1184_v49 = vmul.f32 -1.442695, %v227_v32 }
  0xd8   :  { %1245 = vpow2.f32 %v1183_v38 }
  0xdc   :  { %v1580_v55 = vpop.f32.mrf.mxu0 }
  0xde   :  { %v1582_v56 = vpop.f32.mrf.mxu0 }
  0xe4   :  { %v1244_v33 = vpop.eup %1243 }
  0xe5   :  { %243 = vrot.lane.b32.xlu0 %v1244_v33, %s1342_s20  ;;  %v1246_v39 = vpop.eup %1245 }
  0xe6   :  { %v234_v40 = vadd.f32 1.0, %v1246_v39 }
  0xe8   :  { %1247 = vrcp.f32 %v234_v40 }
  0xf5   :  { %v1248_v41 = vpop.eup %1247 }
  0xf6   :  { %v241_v45 = vmul.f32 0.0, %v1248_v41 }
 0x157   :  { %v244_v42 = vpop.permute.xlu0 %243 }
 0x158   :  { %v246_v43 = vmul.f32 %v1248_v41, %v244_v42 }
 0x15a   :  { %248 = vrot.lane.b32.xlu0 %v246_v43, %s1342_s20 }
 0x1cc   :  { %v249_v46 = vpop.permute.xlu0 %248 }
 0x1cd   :  { %v251_v47 = vadd.f32 %v249_v46, %v241_v45 }
 0x1cf   :  { %1249 = vtanh.f32 %v251_v47  ;;  %v354_v23 = vrot.slane %v251_v47, 6 }
 0x1d0   :  { %1251 = vpow2.f32 %v1184_v49 }
 0x1dc   :  { %v1250_v48 = vpop.eup %1249 }
 0x1dd   :  { %254 = vrot.lane.b32.xlu1 %v1250_v48, %s1342_s20  ;;  %v1252_v50 = vpop.eup %1251 }
 0x1de   :  { %v235_v51 = vadd.f32 1.0, %v1252_v50 }
 0x1e0   :  { %1253 = vrcp.f32 %v235_v51 }
 0x1ed   :  { %v1254_v52 = vpop.eup %1253 }
 0x24f   :  { %v255_v53 = vpop.permute.xlu1 %254 }
 0x250   :  { %v257_v54 = vmul.f32 %v1254_v52, %v255_v53 }
 0x252   :  { %1185 = vmatmul.mubr.msk.f32.vlgmr.msra.gmra.mxu0 %vm151_vm2, %v257_v54 }
 0x253   :  { %510 = vmatpush1.msra.mxu0 %v1394_v1  ;;  %557 = vmatprep.mubr.f32.mxu0 %v1341_v3 }
 0x254   :  { %511 = vmatprep.subr.mxu0 %v1399_v2 }
 0x255   :  { %512 = vmatpush1.msra.mxu0 %v1407_v4 }
 0x256   :  { %513 = vmatprep.subr.mxu0 %v1413_v5 }
 0x257   :  { %514 = vmatpush1.msra.mxu0 %v1422_v7 }
 0x258   :  { %515 = vmatprep.subr.mxu0 %v1432_v9 }
 0x259   :  { %516 = vmatpush1.msra.mxu0 %v1445_v12 }
 0x25a   :  { %517 = vmatprep.subr.mxu0 %v1454_v14 }
 0x25b   :  { %518 = vmatpush1.msra.mxu0 %v1460_v15 }
 0x25c   :  { %519 = vmatprep.subr.mxu0 %v1467_v16 }
 0x25d   :  { %520 = vmatpush1.msra.mxu0 %v1474_v17 }
 0x25e   :  { %521 = vmatprep.subr.mxu0 %v1481_v18 }
 0x25f   :  { %522 = vmatpush1.msra.mxu0 %v1488_v19 }
 0x260   :  { %523 = vmatprep.subr.mxu0 %v1495_v20 }
 0x261   :  { %524 = vmatpush1.msra.mxu0 %v1502_v21 }
 0x262   :  { %734 = vmatprep.subr.mxu0 %v1389_v0 }
 0x312   :  { %v327_v57 = vpop.f32.mrf.mxu0 }
 0x313   :  { %v334_v62 = vrot.slane %v327_v57, 6 }
 0x314   :  { %v329_v58 = vpop.f32.mrf.mxu0 }
 0x315   :  { %v335_v59 = vrot.slane %v329_v58, 6  ;;  %v338_v63 = vadd.f32 %v334_v62, %v1552_v36 }
 0x317   :  { %v339_v60 = vadd.f32 %v335_v59, %v1545_v30  ;;  %v1186_v6 = vmul.f32 -1.442695, %v338_v63 }
 0x319   :  { %1255 = vtanh.f32 %v339_v60  ;;  %v1187_v29 = vmul.f32 -1.442695, %v339_v60 }
 0x31a   :  { %1257 = vpow2.f32 %v1186_v6 }
 0x326   :  { %v1256_v61 = vpop.eup %1255 }
 0x327   :  { %358 = vrot.lane.b32.xlu1 %v1256_v61, %s1342_s20  ;;  %v1258_v8 = vpop.eup %1257 }
 0x328   :  { %v346_v10 = vadd.f32 1.0, %v1258_v8 }
 0x32a   :  { %1259 = vrcp.f32 %v346_v10 }
 0x337   :  { %v1260_v11 = vpop.eup %1259 }
 0x338   :  { %v356_v24 = vmul.f32 %v1260_v11, %v354_v23 }
 0x399   :  { %v359_v13 = vpop.permute.xlu1 %358 }
 0x39a   :  { %v361_v22 = vmul.f32 %v1260_v11, %v359_v13 }
 0x39c   :  { %363 = vrot.lane.b32.xlu0 %v361_v22, %s1342_s20 }
 0x40e   :  { %v364_v25 = vpop.permute.xlu0 %363 }
 0x40f   :  { %v366_v26 = vadd.f32 %v364_v25, %v356_v24 }
 0x411   :  { %1261 = vtanh.f32 %v366_v26  ;;  %v470_v52 = vrot.slane %v366_v26, 6 }
 0x412   :  { %1263 = vpow2.f32 %v1187_v29 }
 0x41e   :  { %v1262_v28 = vpop.eup %1261 }
 0x41f   :  { %369 = vrot.lane.b32.xlu1 %v1262_v28, %s1342_s20  ;;  %v1264_v31 = vpop.eup %1263 }
 0x420   :  { %v347_v32 = vadd.f32 1.0, %v1264_v31 }
 0x422   :  { %1265 = vrcp.f32 %v347_v32 }
 0x42f   :  { %v1266_v33 = vpop.eup %1265 }
 0x491   :  { %v370_v34 = vpop.permute.xlu1 %369 }
 0x492   :  { %v372_v37 = vmul.f32 %v1266_v33, %v370_v34 }
 0x494   :  { %v374_v38 = vrot.slane %v372_v37, 2 }
 0x496   :  { %1188 = vmatmul.mubr.msk.f32.vlgmr.msra.gmra.mxu1 %vm151_vm2, %v374_v38 }
 0x497   :  { %626 = vmatpush1.msra.mxu1 %v1394_v1  ;;  %673 = vmatprep.mubr.f32.mxu1 %v1341_v3 }
 0x498   :  { %627 = vmatprep.subr.mxu1 %v1399_v2 }
 0x499   :  { %628 = vmatpush1.msra.mxu1 %v1407_v4 }
 0x49a   :  { %629 = vmatprep.subr.mxu1 %v1413_v5 }
 0x49b   :  { %630 = vmatpush1.msra.mxu1 %v1422_v7 }
 0x49c   :  { %631 = vmatprep.subr.mxu1 %v1432_v9 }
 0x49d   :  { %632 = vmatpush1.msra.mxu1 %v1445_v12 }
 0x49e   :  { %633 = vmatprep.subr.mxu1 %v1454_v14 }
 0x49f   :  { %634 = vmatpush1.msra.mxu1 %v1460_v15 }
 0x4a0   :  { %635 = vmatprep.subr.mxu1 %v1467_v16 }
 0x4a1   :  { %636 = vmatpush1.msra.mxu1 %v1474_v17 }
 0x4a2   :  { %637 = vmatprep.subr.mxu1 %v1481_v18 }
 0x4a3   :  { %638 = vmatpush1.msra.mxu1 %v1488_v19 }
 0x4a4   :  { %639 = vmatprep.subr.mxu1 %v1495_v20 }
 0x4a5   :  { %640 = vmatpush1.msra.mxu1 %v1502_v21 }
 0x4a6   :  { %850 = vmatprep.subr.mxu1 %v1389_v0 }
 0x556   :  { %v443_v39 = vpop.f32.mrf.mxu1 }
 0x557   :  { %v450_v44 = vrot.slane %v443_v39, 4 }
 0x558   :  { %v445_v40 = vpop.f32.mrf.mxu1 }
 0x559   :  { %v451_v41 = vrot.slane %v445_v40, 4  ;;  %v454_v45 = vadd.f32 %v450_v44, %v1552_v36 }
 0x55b   :  { %v455_v42 = vadd.f32 %v451_v41, %v1545_v30  ;;  %v1189_v46 = vmul.f32 -1.442695, %v454_v45 }
 0x55d   :  { %1267 = vtanh.f32 %v455_v42  ;;  %v1190_v59 = vmul.f32 -1.442695, %v455_v42 }
 0x55e   :  { %1269 = vpow2.f32 %v1189_v46  ;;  %v1655_v46 = vadd.f32 %v1582_v56, %v1542_v27 }
 0x56a   :  { %v1268_v43 = vpop.eup %1267 }
 0x56b   :  { %474 = vrot.lane.b32.xlu0 %v1268_v43, %s1342_s20  ;;  %v1270_v47 = vpop.eup %1269 }
 0x56c   :  { %v462_v48 = vadd.f32 1.0, %v1270_v47 }
 0x56e   :  { %1271 = vrcp.f32 %v462_v48 }
 0x57b   :  { %v1272_v49 = vpop.eup %1271 }
 0x57c   :  { %v472_v53 = vmul.f32 %v1272_v49, %v470_v52 }
 0x5dd   :  { %v475_v50 = vpop.permute.xlu0 %474 }
 0x5de   :  { %v477_v51 = vmul.f32 %v1272_v49, %v475_v50  ;;  %v1661_v50 = vadd.f32 %v1580_v55, %v1549_v35 }
 0x5e0   :  { %479 = vrot.lane.b32.xlu1 %v477_v51, %s1342_s20 }
 0x652   :  { %v480_v54 = vpop.permute.xlu1 %479 }
 0x653   :  { %v482_v57 = vadd.f32 %v480_v54, %v472_v53 }
 0x655   :  { %1273 = vtanh.f32 %v482_v57  ;;  %v586_v33 = vrot.slane %v482_v57, 6 }
 0x656   :  { %1275 = vpow2.f32 %v1190_v59 }
 0x662   :  { %v1274_v58 = vpop.eup %1273 }
 0x663   :  { %485 = vrot.lane.b32.xlu0 %v1274_v58, %s1342_s20  ;;  %v1276_v60 = vpop.eup %1275 }
 0x664   :  { %v463_v61 = vadd.f32 1.0, %v1276_v60 }
 0x666   :  { %1277 = vrcp.f32 %v463_v61 }
 0x673   :  { %v1278_v62 = vpop.eup %1277 }
 0x6d5   :  { %v486_v63 = vpop.permute.xlu0 %485 }
 0x6d6   :  { %v488_v6 = vmul.f32 %v1278_v62, %v486_v63 }
 0x6d8   :  { %v490_v8 = vrot.slane %v488_v6, 4 }
 0x6da   :  { %1191 = vmatmul.mubr.msk.f32.vlgmr.msra.gmra.mxu0 %vm151_vm2, %v490_v8 }
 0x6db   :  { %735 = vmatpush1.msra.mxu0 %v1394_v1  ;;  %782 = vmatprep.mubr.f32.mxu0 %v1341_v3 }
 0x6dc   :  { %736 = vmatprep.subr.mxu0 %v1399_v2 }
 0x6dd   :  { %737 = vmatpush1.msra.mxu0 %v1407_v4 }
 0x6de   :  { %738 = vmatprep.subr.mxu0 %v1413_v5 }
 0x6df   :  { %739 = vmatpush1.msra.mxu0 %v1422_v7 }
 0x6e0   :  { %740 = vmatprep.subr.mxu0 %v1432_v9 }
 0x6e1   :  { %741 = vmatpush1.msra.mxu0 %v1445_v12 }
 0x6e2   :  { %742 = vmatprep.subr.mxu0 %v1454_v14 }
 0x6e3   :  { %743 = vmatpush1.msra.mxu0 %v1460_v15 }
 0x6e4   :  { %744 = vmatprep.subr.mxu0 %v1467_v16 }
 0x6e5   :  { %745 = vmatpush1.msra.mxu0 %v1474_v17 }
 0x6e6   :  { %746 = vmatprep.subr.mxu0 %v1481_v18 }
 0x6e7   :  { %747 = vmatpush1.msra.mxu0 %v1488_v19 }
 0x6e8   :  { %748 = vmatprep.subr.mxu0 %v1495_v20 }
 0x6e9   :  { %749 = vmatpush1.msra.mxu0 %v1502_v21 }
 0x6ea   :  { %966 = vmatprep.subr.mxu0 %v1389_v0 }
 0x79a   :  { %v559_v10 = vpop.f32.mrf.mxu0 }
 0x79b   :  { %v566_v24 = vrot.slane %v559_v10, 2 }
 0x79c   :  { %v561_v11 = vpop.f32.mrf.mxu0 }
 0x79d   :  { %v567_v13 = vrot.slane %v561_v11, 2  ;;  %v570_v25 = vadd.f32 %v566_v24, %v1552_v36 }
 0x79f   :  { %v571_v22 = vadd.f32 %v567_v13, %v1545_v30  ;;  %v1192_v26 = vmul.f32 -1.442695, %v570_v25 }
 0x7a1   :  { %1279 = vtanh.f32 %v571_v22  ;;  %v1193_v39 = vmul.f32 -1.442695, %v571_v22 }
 0x7a2   :  { %1281 = vpow2.f32 %v1192_v26 }
 0x7ae   :  { %v1280_v23 = vpop.eup %1279 }
 0x7af   :  { %590 = vrot.lane.b32.xlu1 %v1280_v23, %s1342_s20  ;;  %v1282_v28 = vpop.eup %1281 }
 0x7b0   :  { %v578_v29 = vadd.f32 1.0, %v1282_v28 }
 0x7b2   :  { %1283 = vrcp.f32 %v578_v29 }
 0x7bf   :  { %v1284_v31 = vpop.eup %1283 }
 0x7c0   :  { %v588_v34 = vmul.f32 %v1284_v31, %v586_v33 }
 0x821   :  { %v591_v32 = vpop.permute.xlu1 %590 }
 0x822   :  { %v593_v0 = vmul.f32 %v1284_v31, %v591_v32 }
 0x824   :  { %595 = vrot.lane.b32.xlu0 %v593_v0, %s1342_s20 }
 0x896   :  { %v596_v30 = vpop.permute.xlu0 %595 }
 0x897   :  { %v598_v37 = vadd.f32 %v596_v30, %v588_v34 }
 0x899   :  { %1285 = vtanh.f32 %v598_v37  ;;  %v696_v58 = vrot.slane %v598_v37, 6 }
 0x89a   :  { %1287 = vpow2.f32 %v1193_v39 }
 0x8a6   :  { %v1286_v38 = vpop.eup %1285 }
 0x8a7   :  { %601 = vrot.lane.b32.xlu1 %v1286_v38, %s1342_s20  ;;  %v1288_v36 = vpop.eup %1287 }
 0x8a8   :  { %v579_v40 = vadd.f32 1.0, %v1288_v36 }
 0x8aa   :  { %1289 = vrcp.f32 %v579_v40 }
 0x8b7   :  { %v1290_v41 = vpop.eup %1289 }
 0x919   :  { %v602_v42 = vpop.permute.xlu1 %601 }
 0x91a   :  { %v604_v43 = vmul.f32 %v1290_v41, %v602_v42 }
 0x91c   :  { %v606_v44 = vrot.slane %v604_v43, 6 }
 0x91e   :  { %1194 = vmatmul.mubr.msk.f32.vlgmr.msra.gmra.mxu1 %vm151_vm2, %v606_v44 }
 0x91f   :  { %851 = vmatpush1.msra.mxu1 %v1394_v1  ;;  %898 = vmatprep.mubr.f32.mxu1 %v1341_v3 }
 0x920   :  { %852 = vmatprep.subr.mxu1 %v1399_v2 }
 0x921   :  { %853 = vmatpush1.msra.mxu1 %v1407_v4 }
 0x922   :  { %854 = vmatprep.subr.mxu1 %v1413_v5 }
 0x923   :  { %855 = vmatpush1.msra.mxu1 %v1422_v7 }
 0x924   :  { %856 = vmatprep.subr.mxu1 %v1432_v9 }
 0x925   :  { %857 = vmatpush1.msra.mxu1 %v1445_v12 }
 0x926   :  { %858 = vmatprep.subr.mxu1 %v1454_v14 }
 0x927   :  { %859 = vmatpush1.msra.mxu1 %v1460_v15 }
 0x928   :  { %860 = vmatprep.subr.mxu1 %v1467_v16 }
 0x929   :  { %861 = vmatpush1.msra.mxu1 %v1474_v17 }
 0x92a   :  { %862 = vmatprep.subr.mxu1 %v1481_v18 }
 0x92b   :  { %863 = vmatpush1.msra.mxu1 %v1488_v19 }
 0x92c   :  { %864 = vmatprep.subr.mxu1 %v1495_v20 }
 0x92d   :  { %865 = vmatpush1.msra.mxu1 %v1502_v21 }
 0x92e   :  { %1219 = vmatprep.subr.mxu1 %v1341_v3 }
 0x9de   :  { %v675_v45 = vpop.f32.mrf.mxu1 }
 0x9df   :  { %v680_v51 = vadd.f32 %v675_v45, %v1661_v50 }
 0x9e0   :  { %v677_v47 = vpop.f32.mrf.mxu1 }
 0x9e1   :  { %v681_v48 = vadd.f32 %v677_v47, %v1655_v46  ;;  %v1195_v52 = vmul.f32 -1.442695, %v680_v51 }
 0x9e3   :  { %1291 = vtanh.f32 %v681_v48  ;;  %v1196_v35 = vmul.f32 -1.442695, %v681_v48 }
 0x9e4   :  { %1293 = vpow2.f32 %v1195_v52 }
 0x9f0   :  { %v1292_v49 = vpop.eup %1291 }
 0x9f1   :  { %700 = vrot.lane.b32.xlu0 %v1292_v49, %s1342_s20  ;;  %v1294_v53 = vpop.eup %1293 }
 0x9f2   :  { %v688_v54 = vadd.f32 1.0, %v1294_v53 }
 0x9f4   :  { %1295 = vrcp.f32 %v688_v54 }
 0xa01   :  { %v1296_v27 = vpop.eup %1295 }
 0xa02   :  { %v698_v59 = vmul.f32 %v1296_v27, %v696_v58 }
 0xa63   :  { %v701_v56 = vpop.permute.xlu0 %700 }
 0xa64   :  { %v703_v57 = vmul.f32 %v1296_v27, %v701_v56 }
 0xa66   :  { %705 = vrot.lane.b32.xlu1 %v703_v57, %s1342_s20 }
 0xad8   :  { %v706_v60 = vpop.permute.xlu1 %705 }
 0xad9   :  { %v708_v61 = vadd.f32 %v706_v60, %v698_v59 }
 0xadb   :  { %1297 = vtanh.f32 %v708_v61 }
 0xadc   :  { %1299 = vpow2.f32 %v1196_v35 }
 0xae8   :  { %v1298_v62 = vpop.eup %1297 }
 0xae9   :  { %711 = vrot.lane.b32.xlu0 %v1298_v62, %s1342_s20  ;;  %v1300_v55 = vpop.eup %1299 }
 0xaea   :  { %v689_v63 = vadd.f32 1.0, %v1300_v55 }
 0xaec   :  { %1301 = vrcp.f32 %v689_v63 }
 0xaf9   :  { %v1302_v6 = vpop.eup %1301 }
 0xb5b   :  { %v712_v8 = vpop.permute.xlu0 %711 }
 0xb5c   :  { %v714_v10 = vmul.f32 %v1302_v6, %v712_v8 }
 0xb5e   :  { %1197 = vmatmul.mubr.msk.f32.vlgmr.msra.gmra.mxu0 %vm151_vm2, %v714_v10 }
 0xb5f   :  { %967 = vmatpush1.msra.mxu0 %v1394_v1  ;;  %1014 = vmatprep.mubr.f32.mxu0 %v1341_v3 }
 0xb60   :  { %968 = vmatprep.subr.mxu0 %v1399_v2 }
 0xb61   :  { %969 = vmatpush1.msra.mxu0 %v1407_v4 }
 0xb62   :  { %970 = vmatprep.subr.mxu0 %v1413_v5 }
 0xb63   :  { %971 = vmatpush1.msra.mxu0 %v1422_v7 }
 0xb64   :  { %972 = vmatprep.subr.mxu0 %v1432_v9 }
 0xb65   :  { %973 = vmatpush1.msra.mxu0 %v1445_v12 }
 0xb66   :  { %974 = vmatprep.subr.mxu0 %v1454_v14 }
 0xb67   :  { %975 = vmatpush1.msra.mxu0 %v1460_v15 }
 0xb68   :  { %976 = vmatprep.subr.mxu0 %v1467_v16 }
 0xb69   :  { %977 = vmatpush1.msra.mxu0 %v1474_v17 }
 0xb6a   :  { %978 = vmatprep.subr.mxu0 %v1481_v18 }
 0xb6b   :  { %979 = vmatpush1.msra.mxu0 %v1488_v19 }
 0xb6c   :  { %980 = vmatprep.subr.mxu0 %v1495_v20  ;;  %v811_v20 = vrot.slane %v708_v61, 6 }
 0xb6d   :  { %981 = vmatpush1.msra.mxu0 %v1502_v21 }
 0xc1e   :  { %v784_v1 = vpop.f32.mrf.mxu0 }
 0xc1f   :  { %v791_v9 = vrot.slane %v784_v1, 6 }
 0xc20   :  { %v786_v2 = vpop.f32.mrf.mxu0 }
 0xc21   :  { %v792_v4 = vrot.slane %v786_v2, 6  ;;  %v795_v12 = vadd.f32 %v791_v9, %v1661_v50  ;;  %v1064_v9 = vld [vmem:[%s1755_s4 + $0x10] sm:$0xff] }
 0xc23   :  { %v796_v5 = vadd.f32 %v792_v4, %v1655_v46  ;;  %v1198_v14 = vmul.f32 -1.442695, %v795_v12  ;;  %v1068_v4 = vld [vmem:[%s1755_s4 + $0x30] sm:$0xff] }
 0xc25   :  { %1303 = vtanh.f32 %v796_v5  ;;  %v1199_v23 = vmul.f32 -1.442695, %v796_v5  ;;  %v1066_v5 = vld [vmem:[%s1755_s4 + $0x20] sm:$0xff] }
 0xc26   :  { %1305 = vpow2.f32 %v1198_v14 }
 0xc32   :  { %v1304_v7 = vpop.eup %1303 }
 0xc33   :  { %815 = vrot.lane.b32.xlu1 %v1304_v7, %s1342_s20  ;;  %v1306_v15 = vpop.eup %1305  ;;  %v1065_v7 = vld [vmem:[%s1755_s4 + $0x18] sm:$0xff] }
 0xc34   :  { %v803_v16 = vadd.f32 1.0, %v1306_v15 }
 0xc36   :  { %1307 = vrcp.f32 %v803_v16 }
 0xc43   :  { %v1308_v17 = vpop.eup %1307 }
 0xc44   :  { %v813_v21 = vmul.f32 %v1308_v17, %v811_v20 }
 0xca5   :  { %v816_v18 = vpop.permute.xlu1 %815 }
 0xca6   :  { %v818_v19 = vmul.f32 %v1308_v17, %v816_v18  ;;  %v1063_v17 = vld [vmem:[%s1755_s4 + $0x8] sm:$0xff]  ;;  %v1062_v18 = vld [vmem:[%s1755_s4] sm:$0xff] }
 0xca8   :  { %820 = vrot.lane.b32.xlu0 %v818_v19, %s1342_s20  ;;  %v1154_v19 = vld [vmem:[%s1756_s6] sm:$0x3]  ;;  %s1345_s6 = smov 112  }
 0xd1a   :  { %v821_v11 = vpop.permute.xlu0 %820 }
 0xd1b   :  { %v823_v13 = vadd.f32 %v821_v11, %v813_v21 }
 0xd1d   :  { %1309 = vtanh.f32 %v823_v13  ;;  %v927_v44 = vrot.slane %v823_v13, 6 }
 0xd1e   :  { %1311 = vpow2.f32 %v1199_v23 }
 0xd2a   :  { %v1310_v22 = vpop.eup %1309 }
 0xd2b   :  { %826 = vrot.lane.b32.xlu1 %v1310_v22, %s1342_s20  ;;  %v1312_v24 = vpop.eup %1311 }
 0xd2c   :  { %v804_v25 = vadd.f32 1.0, %v1312_v24 }
 0xd2e   :  { %1313 = vrcp.f32 %v804_v25 }
 0xd3b   :  { %v1314_v26 = vpop.eup %1313 }
 0xd9d   :  { %v827_v28 = vpop.permute.xlu1 %826 }
 0xd9e   :  { %v829_v29 = vmul.f32 %v1314_v26, %v827_v28 }
 0xda0   :  { %v831_v31 = vrot.slane %v829_v29, 2 }
 0xda2   :  { %1200 = vmatmul.mubr.msk.f32.vlgmr.msra.gmra.mxu1 %vm151_vm2, %v831_v31 }
 0xda3   :  { %1235 = vmatprep.mubr.msk.f32.mxu1 %vm1343_vm3, %v1341_v3 }
 0xe62   :  { %v900_v32 = vpop.f32.mrf.mxu1 }
 0xe63   :  { %v907_v37 = vrot.slane %v900_v32, 4 }
 0xe64   :  { %v902_v0 = vpop.f32.mrf.mxu1 }
 0xe65   :  { %v908_v33 = vrot.slane %v902_v0, 4  ;;  %v911_v38 = vadd.f32 %v907_v37, %v1661_v50 }
 0xe67   :  { %v912_v34 = vadd.f32 %v908_v33, %v1655_v46  ;;  %v1201_v39 = vmul.f32 -1.442695, %v911_v38 }
 0xe69   :  { %1315 = vtanh.f32 %v912_v34  ;;  %v1202_v51 = vmul.f32 -1.442695, %v912_v34 }
 0xe6a   :  { %1317 = vpow2.f32 %v1201_v39 }
 0xe76   :  { %v1316_v30 = vpop.eup %1315 }
 0xe77   :  { %931 = vrot.lane.b32.xlu0 %v1316_v30, %s1342_s20  ;;  %v1318_v36 = vpop.eup %1317 }
 0xe78   :  { %v919_v40 = vadd.f32 1.0, %v1318_v36 }
 0xe7a   :  { %1319 = vrcp.f32 %v919_v40 }
 0xe87   :  { %v1320_v41 = vpop.eup %1319 }
 0xe88   :  { %v929_v45 = vmul.f32 %v1320_v41, %v927_v44 }
 0xee9   :  { %v932_v42 = vpop.permute.xlu0 %931 }
 0xeea   :  { %v934_v43 = vmul.f32 %v1320_v41, %v932_v42 }
 0xeec   :  { %936 = vrot.lane.b32.xlu1 %v934_v43, %s1342_s20 }
 0xf5e   :  { %v937_v47 = vpop.permute.xlu1 %936 }
 0xf5f   :  { %v939_v48 = vadd.f32 %v937_v47, %v929_v45 }
 0xf61   :  { %1321 = vtanh.f32 %v939_v48  ;;  %v1043_v12 = vrot.slane %v939_v48, 6 }
 0xf62   :  { %1323 = vpow2.f32 %v1202_v51 }
 0xf6e   :  { %v1322_v49 = vpop.eup %1321 }
 0xf6f   :  { %942 = vrot.lane.b32.xlu0 %v1322_v49, %s1342_s20  ;;  %v1324_v52 = vpop.eup %1323 }
 0xf70   :  { %v920_v53 = vadd.f32 1.0, %v1324_v52 }
 0xf72   :  { %1325 = vrcp.f32 %v920_v53 }
 0xf7f   :  { %v1326_v54 = vpop.eup %1325 }
 0xfe1   :  { %v943_v27 = vpop.permute.xlu0 %942 }
 0xfe2   :  { %v945_v56 = vmul.f32 %v1326_v54, %v943_v27 }
 0xfe4   :  { %v947_v57 = vrot.slane %v945_v56, 4 }
 0xfe6   :  { %1203 = vmatmul.mubr.msk.f32.vlgmr.msra.gmra.mxu0 %vm151_vm2, %v947_v57 }
0x10a6   :  { %v1016_v58 = vpop.f32.mrf.mxu0 }
0x10a7   :  { %v1023_v35 = vrot.slane %v1016_v58, 2 }
0x10a8   :  { %v1018_v59 = vpop.f32.mrf.mxu0 }
0x10a9   :  { %v1024_v60 = vrot.slane %v1018_v59, 2  ;;  %v1027_v55 = vadd.f32 %v1023_v35, %v1661_v50  ;;  %v1067_v50 = vld [vmem:[%s1755_s4 + $0x28] sm:$0xff] }
0x10ab   :  { %v1028_v61 = vadd.f32 %v1024_v60, %v1655_v46  ;;  %v1204_v63 = vmul.f32 -1.442695, %v1027_v55  ;;  %v1069_v46 = vld [vmem:[%s1755_s4 + $0x38] sm:$0xff] }
0x10ac   :  { %1220 = vmatpush3.msra.mxu1 %v1069_v46 }
0x10ad   :  { %1327 = vtanh.f32 %v1028_v61  ;;  %1221 = vmatprep.subr.mxu1 %v1341_v3  ;;  %v1205_v21 = vmul.f32 -1.442695, %v1028_v61 }
0x10ae   :  { %1329 = vpow2.f32 %v1204_v63  ;;  %1222 = vmatpush3.msra.mxu1 %v1068_v4 }
0x10af   :  { %1223 = vmatprep.subr.mxu1 %v1341_v3 }
0x10b0   :  { %1224 = vmatpush3.msra.mxu1 %v1067_v50 }
0x10b1   :  { %1225 = vmatprep.subr.mxu1 %v1341_v3 }
0x10b2   :  { %1226 = vmatpush3.msra.mxu1 %v1066_v5 }
0x10b3   :  { %1227 = vmatprep.subr.mxu1 %v1341_v3 }
0x10b4   :  { %1228 = vmatpush3.msra.mxu1 %v1065_v7 }
0x10b5   :  { %1229 = vmatprep.subr.mxu1 %v1341_v3 }
0x10b6   :  { %1230 = vmatpush3.msra.mxu1 %v1064_v9 }
0x10b7   :  { %1231 = vmatprep.subr.mxu1 %v1341_v3 }
0x10b8   :  { %1232 = vmatpush3.msra.mxu1 %v1063_v17 }
0x10b9   :  { %1233 = vmatprep.subr.mxu1 %v1341_v3  ;;  %v1206_v3 = vld [vmem:[%s1757_s5] ss:$0 sm:$0xff] }
0x10ba   :  { %v1328_v62 = vpop.eup %1327  ;;  %1234 = vmatpush3.msra.mxu1 %v1062_v18 }
0x10bb   :  { %1047 = vrot.lane.b32.xlu1 %v1328_v62, %s1342_s20  ;;  %v1330_v6 = vpop.eup %1329 }
0x10bc   :  { %v1035_v8 = vadd.f32 1.0, %v1330_v6 }
0x10be   :  { %1331 = vrcp.f32 %v1035_v8 }
0x10cb   :  { %v1332_v10 = vpop.eup %1331 }
0x10cc   :  { %v1045_v14 = vmul.f32 %v1332_v10, %v1043_v12 }
0x112d   :  { %v1048_v1 = vpop.permute.xlu1 %1047 }
0x112e   :  { %v1050_v2 = vmul.f32 %v1332_v10, %v1048_v1 }
0x1130   :  { %1052 = vrot.lane.b32.xlu0 %v1050_v2, %s1342_s20 }
0x1134   :  { %1156 = vrot.lane.b32.xlu0 %v1154_v19, %s1344_s15 }
0x11a2   :  { %v1053_v15 = vpop.permute.xlu0 %1052 }
0x11a3   :  { %v1055_v16 = vadd.f32 %v1053_v15, %v1045_v14 }
0x11a5   :  { %1333 = vtanh.f32 %v1055_v16 }
0x11a6   :  { %1335 = vpow2.f32 %v1205_v21  ;;  %v1157_v0 = vpop.permute.xlu0 %1156 }
0x11b2   :  { %v1334_v20 = vpop.eup %1333 }
0x11b3   :  { %1058 = vrot.lane.b32.xlu1 %v1334_v20, %s1342_s20  ;;  %v1336_v11 = vpop.eup %1335 }
0x11b4   :  { %v1036_v13 = vadd.f32 1.0, %v1336_v11 }
0x11b6   :  { %1337 = vrcp.f32 %v1036_v13 }
0x11c3   :  { %v1338_v22 = vpop.eup %1337 }
0x1225   :  { %v1059_v23 = vpop.permute.xlu1 %1058 }
0x1226   :  { %v1061_v24 = vmul.f32 %v1338_v22, %v1059_v23 }
0x1228   :  { %v1078_v25 = vrot.slane %v1061_v24, 6 }
0x122a   :  { %1236 = vmatmul.mubr.msk.f32.vlgmr.msra.gmra.mxu1 %vm151_vm2, %v1078_v25 }
0x12ea   :  { %v1147_v26 = vpop.f32.mrf.mxu1 }
0x12eb   :  { %v1148_v28 = vadd.f32 %v1206_v3, %v1147_v26 }
0x12ec   :  { %v1237_v29 = vpop.f32.mrf.mxu1 }
0x12ed   :  { %v1151_v31 = vmul.f32 0.5, %v1148_v28  ;;  %1170 = vrot.lane.b32.xlu0 %v1148_v28, %s1345_s6  ;;  %1208 = vst.msk [vmem:[%s1758_s7 + $0x2] sm:$0x3] %vm1165_vm4, %v1148_v28 }
0x12ef   :  { %v1152_v32 = vmul.f32 1.442695, %v1151_v31 }
0x12f1   :  { %1339 = vpow2.f32 %v1152_v32 }
0x12fe   :  { %v1340_v33 = vpop.eup %1339 }
0x12ff   :  { %v1159_v34 = vmul.f32 %v1340_v33, %v1157_v0 }
0x1301   :  { %1161 = vrot.lane.b32.xlu1 %v1159_v34, %s1345_s6 }
0x135f   :  { %v1171_v30 = vpop.permute.xlu0 %1170 }
0x1360   :  { %1209 = vst.msk [vmem:[%s1758_s7 + $0x4] sm:$0x3] %vm1165_vm4, %v1171_v30 }
0x1373   :  { %v1162_v37 = vpop.permute.xlu1 %1161 }
0x1374   :  { %v1164_v38 = vadd.f32 %v1162_v37, %v1148_v28 }
0x1376   :  { %1166 = vst.msk [vmem:[%s1758_s7] sm:$0x3] %vm1165_vm4, %v1164_v38 }

</bundles_post_ra>
